<compile_context>
chip_gen: v7x
topology: tpu7x:2x2x1
jax: 0.10.0
libtpu: 0.0.40
codegen_flags: <defaults>
</compile_context>

<pallas_src>
import functools

import jax
import jax.numpy as jnp
from jax.experimental import pallas as pl
from jax.experimental.pallas import tpu as pltpu


# ---------------------------------------------------------------------------
# Generation-aware VMEM budgets
# ---------------------------------------------------------------------------
def _vmem_budgets():
    """Returns (vmem_limit_bytes, per-step tile budget, whole-slab fusion budget)."""
    cap = 64 * 2**20                      # conservative default (v7x-sized VMEM)
    try:
        info = pltpu.get_tpu_info()
        c = getattr(info, "vmem_capacity_bytes", None)
        if c:
            cap = int(c)
    except Exception:
        pass
    # v5e/v6e (128 MiB) -> ~92 MiB limit, 24 MiB tiles, 48 MiB fusion budget.
    # v7x (64 MiB)      -> ~46 MiB limit, ~11 MiB tiles, ~25 MiB fusion budget.
    vmem_limit = min(int(cap * 0.72), 96 * 2**20)
    tile_budget = min(vmem_limit // 4, 24 * 2**20)
    fused_budget = min(int(vmem_limit * 0.55), 48 * 2**20)
    return vmem_limit, tile_budget, fused_budget


def _choose_tn(n, bytes_per_n, budget):
    """Largest lane-aligned (multiple-of-128) N tile whose per-step working set
    fits `budget`.  A partial tail tile is allowed (masked in-kernel)."""
    if n <= 128:
        return n
    cap = (n // 128) * 128                      # keep TN <= N
    tn = max(128, min((budget // max(bytes_per_n, 1)) // 128 * 128, cap))
    if n % 128 == 0:
        # Prefer an exact divisor close below tn (avoids a padded tail tile),
        # but don't shrink by more than ~25% just to get divisibility.
        d, lo = tn, max(128, tn - tn // 4)
        while d >= lo and n % d:
            d -= 128
        if d >= lo and n % d == 0:
            tn = d
    return tn


# ---------------------------------------------------------------------------
# Fully fused single-pass kernel (per-batch slab resident in VMEM)
# ---------------------------------------------------------------------------
def _ffn_fused_kernel(x_ref, w1_ref, b1_ref, w2_ref, b2_ref,
                      gamma_ref, beta_ref, o_ref, *, num_groups, eps):
    # x_ref/o_ref: (1, C, N)   w1: (I, C)  b1: (I, 1)  w2: (C, I)  b2: (C, 1)
    # gamma/beta: (C, 1)
    x = x_ref[0].astype(jnp.float32)                               # (C, N)
    w1 = w1_ref[...]
    w2 = w2_ref[...]

    # Conv3d(C->I, k=1) == W1 @ x ; Swish ; cast narrow before the 2nd dot.
    h = jnp.dot(w1, x.astype(w1.dtype),
                preferred_element_type=jnp.float32) + b1_ref[...]
    h = (h * jax.nn.sigmoid(h)).astype(w2.dtype)
    # TODO(synk): nn.Dropout with p > 0 (training mode) not implemented; the
    # module default p=0.0 / eval mode is an identity, which is what we do.

    # Conv3d(I->C, k=1) == W2 @ h, residual in f32.
    h = jnp.dot(w2, h, preferred_element_type=jnp.float32) + b2_ref[...]
    h = h + x                                                      # (C, N) f32

    C, N = h.shape
    Cg = C // num_groups
    cnt = jnp.float32(Cg * N)

    # GroupNorm with centered variance (accurate; h is VMEM-resident so the
    # second reduction is cheap).  Group combine on tiny (C,1)/(1,1) arrays.
    s = jnp.sum(h, axis=1, keepdims=True)                          # (C, 1)
    mean_parts = []
    for g in range(num_groups):
        gm = jnp.sum(s[g * Cg:(g + 1) * Cg, :], axis=0, keepdims=True) / cnt
        mean_parts.append(jnp.broadcast_to(gm, (Cg, 1)))
    mean_c = jnp.concatenate(mean_parts, axis=0)                   # (C, 1)

    d = h - mean_c
    v = jnp.sum(d * d, axis=1, keepdims=True)                      # (C, 1)
    inv_parts = []
    for g in range(num_groups):
        gv = jnp.sum(v[g * Cg:(g + 1) * Cg, :], axis=0, keepdims=True) / cnt
        inv_parts.append(jnp.broadcast_to(jax.lax.rsqrt(gv + eps), (Cg, 1)))
    inv_c = jnp.concatenate(inv_parts, axis=0)                     # (C, 1)

    y = d * (inv_c * gamma_ref[...]) + beta_ref[...]
    o_ref[0] = (y * jax.nn.sigmoid(y)).astype(o_ref.dtype)         # final Swish


# ---------------------------------------------------------------------------
# Two-pass streaming path, pass 1: FFN + residual + per-channel stats
# ---------------------------------------------------------------------------
def _ffn_stats_kernel(x_ref, w1_ref, b1_ref, w2_ref, b2_ref,
                      h_ref, sum_ref, sq_ref, *, n_total, tn, nts):
    # grid = (B, S, NTS); N-tile index = s * nts + t
    t = pl.program_id(2)

    @pl.when(t == 0)
    def _init():
        sum_ref[...] = jnp.zeros_like(sum_ref)
        sq_ref[...] = jnp.zeros_like(sq_ref)

    x = x_ref[0].astype(jnp.float32)                               # (C, TN)
    w1 = w1_ref[...]
    w2 = w2_ref[...]

    h = jnp.dot(w1, x.astype(w1.dtype),
                preferred_element_type=jnp.float32) + b1_ref[...]
    h = (h * jax.nn.sigmoid(h)).astype(w2.dtype)                   # Swish, narrow temp
    h = jnp.dot(w2, h, preferred_element_type=jnp.float32) + b2_ref[...]
    h = h + x                                                      # residual (f32)
    h_ref[0] = h.astype(h_ref.dtype)                               # bf16 h by default

    # Mask lanes beyond the true N (partial tail tile), then accumulate the
    # GroupNorm partial stats in f32 (from the pre-downcast value).
    s_idx = pl.program_id(1)
    col = (s_idx * nts + t) * tn + jax.lax.broadcasted_iota(jnp.int32, h.shape, 1)
    hm = jnp.where(col < n_total, h, 0.0)
    sum_ref[0] += jnp.sum(hm, axis=1, keepdims=True)               # (C, 1)
    sq_ref[0] += jnp.sum(hm * hm, axis=1, keepdims=True)           # (C, 1)


# ---------------------------------------------------------------------------
# Two-pass streaming path, pass 2: folded GroupNorm affine + Swish
# ---------------------------------------------------------------------------
def _norm_swish_kernel(h_ref, scale_ref, shift_ref, o_ref):
    y = h_ref[0].astype(jnp.float32) * scale_ref[0] + shift_ref[0]
    o_ref[0] = (y * jax.nn.sigmoid(y)).astype(o_ref.dtype)


# ---------------------------------------------------------------------------
# Wrapper
# ---------------------------------------------------------------------------
def feed_forward_pallas(x_ncdhw, params, num_groups, *,
                        compute_dtype=jnp.bfloat16, eps=1e-5,
                        force_two_pass=False, tile_budget_bytes=None):
    """x_ncdhw: (B, C, D, H, W).  params (PyTorch-native shapes):
      w1: (I, C) (= Conv3d(C->I).weight[:,:,0,0,0]),  b1: (I,)
      w2: (C, I),  b2: (C,),  gamma: (C,),  beta: (C,)"""
    B, C, D, H, W = x_ncdhw.shape
    N = D * H * W
    I = params["w1"].shape[0]
    G = num_groups
    assert C % G == 0, "GroupNorm requires C % num_groups == 0"
    Cg = C // G

    x = x_ncdhw.reshape(B, C, N)          # pure reshape, no HBM transpose
    out_dtype = x_ncdhw.dtype

    vmem_limit, tile_budget, fused_budget = _vmem_budgets()
    if tile_budget_bytes is not None:
        tile_budget = int(tile_budget_bytes)

    w1 = params["w1"].astype(compute_dtype)              # (I, C)
    w2 = params["w2"].astype(compute_dtype)              # (C, I)
    b1 = params["b1"].reshape(I, 1).astype(jnp.float32)
    b2 = params["b2"].reshape(C, 1).astype(jnp.float32)
    gamma = params["gamma"].astype(jnp.float32)          # (C,)
    beta = params["beta"].astype(jnp.float32)

    cb = jnp.dtype(compute_dtype).itemsize
    ob = jnp.dtype(out_dtype).itemsize

    # ---------------- fully fused path (h never written to HBM) -------------
    fused_bytes = N * (8 * C + 2 * ob * C + 16 * C + (4 + cb) * I) \
        + 2 * cb * I * C * 2 + 4 * (I + 4 * C)
    if (not force_two_pass) and fused_bytes <= fused_budget:
        kernel = functools.partial(_ffn_fused_kernel, num_groups=G, eps=eps)
        out = pl.pallas_call(
            kernel,
            out_shape=jax.ShapeDtypeStruct((B, C, N), out_dtype),
            grid_spec=pltpu.PrefetchScalarGridSpec(
                num_scalar_prefetch=0,
                grid=(B,),
                in_specs=[
                    pl.BlockSpec((1, C, N), lambda b: (b, 0, 0)),   # x
                    pl.BlockSpec((I, C), lambda b: (0, 0)),         # w1
                    pl.BlockSpec((I, 1), lambda b: (0, 0)),         # b1
                    pl.BlockSpec((C, I), lambda b: (0, 0)),         # w2
                    pl.BlockSpec((C, 1), lambda b: (0, 0)),         # b2
                    pl.BlockSpec((C, 1), lambda b: (0, 0)),         # gamma
                    pl.BlockSpec((C, 1), lambda b: (0, 0)),         # beta
                ],
                out_specs=pl.BlockSpec((1, C, N), lambda b: (b, 0, 0)),
            ),
            compiler_params=pltpu.CompilerParams(
                dimension_semantics=("parallel",),
                vmem_limit_bytes=vmem_limit),
        )(x, w1, b1, w2, b2, gamma.reshape(C, 1), beta.reshape(C, 1))
        return out.reshape(B, C, D, H, W)

    # ---------------- two-pass streaming path --------------------------------
    # Pass 1 tile: x (f32, 2x bufs) + h out (compute dtype, 2x bufs)
    #              + (I, TN) intermediate + f32 temps.
    p1_bytes_per_n = 8 * C + 2 * cb * C + 12 * C + (4 + cb) * I
    TN = _choose_tn(N, p1_bytes_per_n, tile_budget)
    NT = pl.cdiv(N, TN)

    # When B == 1 split the N-tile loop across an extra "parallel" axis so a
    # v7x chip (2 TensorCores) isn't limited to one core; per-split partial
    # stats are combined in the JAX finalize below.  (No-op on v5e/v6e.)
    S = 2 if (B == 1 and NT >= 2 and NT % 2 == 0) else 1
    NTS = NT // S

    kernel1 = functools.partial(_ffn_stats_kernel, n_total=N, tn=TN, nts=NTS)
    h, ssum, ssq = pl.pallas_call(
        kernel1,
        out_shape=(jax.ShapeDtypeStruct((B, C, N), compute_dtype),
                   jax.ShapeDtypeStruct((B * S, C, 1), jnp.float32),
                   jax.ShapeDtypeStruct((B * S, C, 1), jnp.float32)),
        grid_spec=pltpu.PrefetchScalarGridSpec(
            num_scalar_prefetch=0,
            grid=(B, S, NTS),
            in_specs=[
                pl.BlockSpec((1, C, TN), lambda b, s, t: (b, 0, s * NTS + t)),
                pl.BlockSpec((I, C), lambda b, s, t: (0, 0)),
                pl.BlockSpec((I, 1), lambda b, s, t: (0, 0)),
                pl.BlockSpec((C, I), lambda b, s, t: (0, 0)),
                pl.BlockSpec((C, 1), lambda b, s, t: (0, 0)),
            ],
            out_specs=[
                pl.BlockSpec((1, C, TN), lambda b, s, t: (b, 0, s * NTS + t)),
                pl.BlockSpec((1, C, 1), lambda b, s, t: (b * S + s, 0, 0)),
                pl.BlockSpec((1, C, 1), lambda b, s, t: (b * S + s, 0, 0)),
            ],
        ),
        compiler_params=pltpu.CompilerParams(
            dimension_semantics=("parallel", "parallel", "arbitrary"),
            vmem_limit_bytes=vmem_limit),
    )(x, w1, b1, w2, b2)

    # -- Finalize GroupNorm stats on tiny (B, C) arrays in plain JAX --
    sum_c = ssum[..., 0].reshape(B, S, C).sum(axis=1)    # (B, C)
    sq_c = ssq[..., 0].reshape(B, S, C).sum(axis=1)      # (B, C)
    gsum = sum_c.reshape(B, G, Cg).sum(axis=2)           # (B, G)
    gsq = sq_c.reshape(B, G, Cg).sum(axis=2)             # (B, G)
    cnt = jnp.float32(N * Cg)
    mean = gsum / cnt
    # TODO(synk): E[x^2]-E[x]^2 can cancel for very large N*Cg; a per-tile
    # centered / Welford combine would be more robust (clamp keeps it finite).
    var = jnp.maximum(gsq / cnt - mean * mean, 0.0)
    inv = jax.lax.rsqrt(var + eps)
    mean_c = jnp.repeat(mean, Cg, axis=1)                # (B, C)
    inv_c = jnp.repeat(inv, Cg, axis=1)
    g_ = gamma[None, :]
    b_ = beta[None, :]
    scale = (inv_c * g_)[..., None]                      # (B, C, 1)
    shift = (b_ - mean_c * inv_c * g_)[..., None]        # (B, C, 1)

    # -- Pass 2: pure streaming -> its own (larger) tile --
    p2_bytes_per_n = 2 * cb * C + 2 * ob * C + 8 * C
    TN2 = _choose_tn(N, p2_bytes_per_n, tile_budget)
    NT2 = pl.cdiv(N, TN2)

    out = pl.pallas_call(
        _norm_swish_kernel,
        out_shape=jax.ShapeDtypeStruct((B, C, N), out_dtype),
        grid_spec=pltpu.PrefetchScalarGridSpec(
            num_scalar_prefetch=0,
            grid=(B, NT2),
            in_specs=[
                pl.BlockSpec((1, C, TN2), lambda b, t: (b, 0, t)),   # h
                pl.BlockSpec((1, C, 1), lambda b, t: (b, 0, 0)),     # scale
                pl.BlockSpec((1, C, 1), lambda b, t: (b, 0, 0)),     # shift
            ],
            out_specs=pl.BlockSpec((1, C, TN2), lambda b, t: (b, 0, t)),
        ),
        compiler_params=pltpu.CompilerParams(
            dimension_semantics=("parallel", "parallel"),
            vmem_limit_bytes=vmem_limit),
    )(h, scale, shift)

    return out.reshape(B, C, D, H, W)


# ---------------------------------------------------------------------------
# Pure-JAX reference (matches PyTorch semantics)
# ---------------------------------------------------------------------------
def feed_forward_ref(x_ncdhw, params, num_groups):
    B, C, D, H, W = x_ncdhw.shape
    N = D * H * W
    x = x_ncdhw.reshape(B, C, N).astype(jnp.float32)
    h = jnp.einsum("ic,bcn->bin", params["w1"], x) + params["b1"][None, :, None]
    h = h * jax.nn.sigmoid(h)
    h = jnp.einsum("ci,bin->bcn", params["w2"], h) + params["b2"][None, :, None]
    h = h + x
    hg = h.reshape(B, num_groups, C // num_groups, N)
    mean = hg.mean(axis=(2, 3), keepdims=True)
    var = hg.var(axis=(2, 3), keepdims=True)
    hg = (hg - mean) * jax.lax.rsqrt(var + 1e-5)
    h = (hg.reshape(B, C, N) * params["gamma"][None, :, None]
         + params["beta"][None, :, None])
    h = h * jax.nn.sigmoid(h)
    return h.reshape(B, C, D, H, W)


if __name__ == "__main__":
    # Module-consistent small shapes: query_dim=8, num_groups=2, mult=4.
    C, G, mult = 8, 2, 4
    I = C * mult

    key = jax.random.PRNGKey(0)
    kp, k1, k2, k3, k4, kx1, kx2, kx3 = jax.random.split(key, 8)
    params = {
        "w1": jax.random.normal(k1, (I, C), dtype=jnp.float32) * 0.1,
        "b1": jax.random.normal(k2, (I,), dtype=jnp.float32) * 0.1,
        "w2": jax.random.normal(k3, (C, I), dtype=jnp.float32) * 0.1,
        "b2": jax.random.normal(k4, (C,), dtype=jnp.float32) * 0.1,
        "gamma": jnp.ones((C,), dtype=jnp.float32),
        "beta": jnp.zeros((C,), dtype=jnp.float32),
    }

    # 1) Fused single-pass path (small N): tight f32 check + loose bf16 check.
    x1 = jax.random.normal(kx1, (2, C, 4, 4, 4), dtype=jnp.float32)
    ref1 = feed_forward_ref(x1, params, G)
    o = jax.block_until_ready(
        feed_forward_pallas(x1, params, G, compute_dtype=jnp.float32))
    assert o.shape == x1.shape
    assert jnp.allclose(o, ref1, atol=1e-4, rtol=1e-4), "fused f32 mismatch"
    o = jax.block_until_ready(
        feed_forward_pallas(x1, params, G, compute_dtype=jnp.bfloat16))
    assert jnp.allclose(o, ref1, atol=3e-2, rtol=3e-2), "fused bf16 mismatch"

    # 2) Two-pass streaming path (forced, small tile budget -> multi-tile
    #    stats accumulation), f32 tight check.
    x2 = jax.random.normal(kx2, (2, C, 4, 8, 8), dtype=jnp.float32)
    ref2 = feed_forward_ref(x2, params, G)
    o = jax.block_until_ready(feed_forward_pallas(
        x2, params, G, compute_dtype=jnp.float32,
        force_two_pass=True, tile_budget_bytes=64 * 1024))
    assert jnp.allclose(o, ref2, atol=1e-4, rtol=1e-4), "two-pass f32 mismatch"

    # 3) Two-pass, ragged N (masked tail tile) with B=1 (core-split of the
    #    tile loop) and bf16 h storage: loose check.
    x3 = jax.random.normal(kx3, (1, C, 5, 6, 7), dtype=jnp.float32)
    ref3 = feed_forward_ref(x3, params, G)
    o = jax.block_until_ready(feed_forward_pallas(
        x3, params, G, compute_dtype=jnp.bfloat16, force_two_pass=True))
    assert jnp.allclose(o, ref3, atol=3e-2, rtol=3e-2), "two-pass bf16 mismatch"

    print("KERNEL_OK")
</pallas_src>

<mosaic_0001>
module attributes {stable_mosaic.version = 11 : i64} {
  func.func @_ffn_fused_kernel(%arg0: i32, %arg1: memref<1x8x64xf32, #tpu.memory_space<vmem>>, %arg2: memref<32x8xf32, #tpu.memory_space<vmem>>, %arg3: memref<32x1xf32, #tpu.memory_space<vmem>>, %arg4: memref<8x32xf32, #tpu.memory_space<vmem>>, %arg5: memref<8x1xf32, #tpu.memory_space<vmem>>, %arg6: memref<8x1xf32, #tpu.memory_space<vmem>>, %arg7: memref<8x1xf32, #tpu.memory_space<vmem>>, %arg8: memref<1x8x64xf32, #tpu.memory_space<vmem>>) attributes {dimension_semantics = [#tpu.dimension_semantics<parallel>], iteration_bounds = array<i64: 2>, scalar_prefetch = 0 : i64, scratch_operands = 0 : i64, tpu.core_type = #tpu.core_type<tc>, window_params = [{transform_indices = @transform_0, window_bounds = array<i64: 1, 8, 64>}, {pipeline_mode = #tpu.pipeline_mode<synchronous>, transform_indices = @transform_1, window_bounds = array<i64: 32, 8>}, {pipeline_mode = #tpu.pipeline_mode<synchronous>, transform_indices = @transform_2, window_bounds = array<i64: 32, 1>}, {pipeline_mode = #tpu.pipeline_mode<synchronous>, transform_indices = @transform_3, window_bounds = array<i64: 8, 32>}, {pipeline_mode = #tpu.pipeline_mode<synchronous>, transform_indices = @transform_4, window_bounds = array<i64: 8, 1>}, {pipeline_mode = #tpu.pipeline_mode<synchronous>, transform_indices = @transform_5, window_bounds = array<i64: 8, 1>}, {pipeline_mode = #tpu.pipeline_mode<synchronous>, transform_indices = @transform_6, window_bounds = array<i64: 8, 1>}, {transform_indices = @transform_7, window_bounds = array<i64: 1, 8, 64>}]} {
    %c0 = arith.constant 0 : index
    %c0_0 = arith.constant 0 : index
    %c0_1 = arith.constant 0 : index
    %0 = vector.load %arg1[%c0, %c0_0, %c0_1] : memref<1x8x64xf32, #tpu.memory_space<vmem>>, vector<1x8x64xf32>
    %1 = vector.shape_cast %0 : vector<1x8x64xf32> to vector<8x64xf32>
    %c0_2 = arith.constant 0 : index
    %c0_3 = arith.constant 0 : index
    %2 = vector.load %arg2[%c0_2, %c0_3] : memref<32x8xf32, #tpu.memory_space<vmem>>, vector<32x8xf32>
    %c0_4 = arith.constant 0 : index
    %c0_5 = arith.constant 0 : index
    %3 = vector.load %arg4[%c0_4, %c0_5] : memref<8x32xf32, #tpu.memory_space<vmem>>, vector<8x32xf32>
    %cst = arith.constant dense<0.000000e+00> : vector<32x64xf32>
    %4 = tpu.matmul %2, %1, %cst {dimension_numbers = #tpu.dot_dimension_numbers<[1], [0], [0], [1], [0, 0, 1, 1], [], []>} : vector<32x8xf32>, vector<8x64xf32>, vector<32x64xf32> -> vector<32x64xf32>
    %c0_6 = arith.constant 0 : index
    %c0_7 = arith.constant 0 : index
    %5 = vector.load %arg3[%c0_6, %c0_7] : memref<32x1xf32, #tpu.memory_space<vmem>>, vector<32x1xf32>
    %6 = vector.broadcast %5 : vector<32x1xf32> to vector<32x64xf32>
    %7 = arith.addf %4, %6 : vector<32x64xf32>
    %8 = arith.negf %7 : vector<32x64xf32>
    %9 = math.exp %8 : vector<32x64xf32>
    %cst_8 = arith.constant 1.000000e+00 : f32
    %10 = vector.broadcast %cst_8 : f32 to vector<32x64xf32>
    %11 = arith.addf %10, %9 : vector<32x64xf32>
    %12 = arith.divf %10, %11 : vector<32x64xf32>
    %13 = arith.mulf %7, %12 : vector<32x64xf32>
    %cst_9 = arith.constant dense<0.000000e+00> : vector<8x64xf32>
    %14 = tpu.matmul %3, %13, %cst_9 {dimension_numbers = #tpu.dot_dimension_numbers<[1], [0], [0], [1], [0, 0, 1, 1], [], []>} : vector<8x32xf32>, vector<32x64xf32>, vector<8x64xf32> -> vector<8x64xf32>
    %c0_10 = arith.constant 0 : index
    %c0_11 = arith.constant 0 : index
    %15 = vector.load %arg5[%c0_10, %c0_11] : memref<8x1xf32, #tpu.memory_space<vmem>>, vector<8x1xf32>
    %16 = vector.broadcast %15 : vector<8x1xf32> to vector<8x64xf32>
    %17 = arith.addf %14, %16 : vector<8x64xf32>
    %18 = arith.addf %17, %1 : vector<8x64xf32>
    %cst_12 = arith.constant dense<0.000000e+00> : vector<8xf32>
    %19 = vector.multi_reduction <add>, %18, %cst_12 [1] : vector<8x64xf32> to vector<8xf32>
    %20 = vector.shape_cast %19 : vector<8xf32> to vector<8x1xf32>
    %21 = vector.extract_strided_slice %20 {offsets = [0, 0], sizes = [4, 1], strides = [1, 1]} : vector<8x1xf32> to vector<4x1xf32>
    %cst_13 = arith.constant dense<0.000000e+00> : vector<1xf32>
    %22 = vector.multi_reduction <add>, %21, %cst_13 [0] : vector<4x1xf32> to vector<1xf32>
    %23 = vector.shape_cast %22 : vector<1xf32> to vector<1x1xf32>
    %cst_14 = arith.constant 2.560000e+02 : f32
    %24 = vector.broadcast %cst_14 : f32 to vector<1x1xf32>
    %25 = arith.divf %23, %24 : vector<1x1xf32>
    %26 = vector.shape_cast %25 : vector<1x1xf32> to vector<1x1xf32>
    %27 = vector.broadcast %26 : vector<1x1xf32> to vector<4x1xf32>
    %28 = vector.extract_strided_slice %20 {offsets = [4, 0], sizes = [4, 1], strides = [1, 1]} : vector<8x1xf32> to vector<4x1xf32>
    %cst_15 = arith.constant dense<0.000000e+00> : vector<1xf32>
    %29 = vector.multi_reduction <add>, %28, %cst_15 [0] : vector<4x1xf32> to vector<1xf32>
    %30 = vector.shape_cast %29 : vector<1xf32> to vector<1x1xf32>
    %cst_16 = arith.constant 2.560000e+02 : f32
    %31 = vector.broadcast %cst_16 : f32 to vector<1x1xf32>
    %32 = arith.divf %30, %31 : vector<1x1xf32>
    %33 = vector.shape_cast %32 : vector<1x1xf32> to vector<1x1xf32>
    %34 = vector.broadcast %33 : vector<1x1xf32> to vector<4x1xf32>
    %35 = tpu.concatenate %27, %34 in 0 : vector<4x1xf32>, vector<4x1xf32> -> vector<8x1xf32>
    %36 = vector.broadcast %35 : vector<8x1xf32> to vector<8x64xf32>
    %37 = arith.subf %18, %36 : vector<8x64xf32>
    %38 = arith.mulf %37, %37 : vector<8x64xf32>
    %cst_17 = arith.constant dense<0.000000e+00> : vector<8xf32>
    %39 = vector.multi_reduction <add>, %38, %cst_17 [1] : vector<8x64xf32> to vector<8xf32>
    %40 = vector.shape_cast %39 : vector<8xf32> to vector<8x1xf32>
    %41 = vector.extract_strided_slice %40 {offsets = [0, 0], sizes = [4, 1], strides = [1, 1]} : vector<8x1xf32> to vector<4x1xf32>
    %cst_18 = arith.constant dense<0.000000e+00> : vector<1xf32>
    %42 = vector.multi_reduction <add>, %41, %cst_18 [0] : vector<4x1xf32> to vector<1xf32>
    %43 = vector.shape_cast %42 : vector<1xf32> to vector<1x1xf32>
    %cst_19 = arith.constant 2.560000e+02 : f32
    %44 = vector.broadcast %cst_19 : f32 to vector<1x1xf32>
    %45 = arith.divf %43, %44 : vector<1x1xf32>
    %cst_20 = arith.constant 9.99999974E-6 : f32
    %46 = vector.broadcast %cst_20 : f32 to vector<1x1xf32>
    %47 = arith.addf %45, %46 : vector<1x1xf32>
    %48 = math.rsqrt %47 : vector<1x1xf32>
    %49 = vector.shape_cast %48 : vector<1x1xf32> to vector<1x1xf32>
    %50 = vector.broadcast %49 : vector<1x1xf32> to vector<4x1xf32>
    %51 = vector.extract_strided_slice %40 {offsets = [4, 0], sizes = [4, 1], strides = [1, 1]} : vector<8x1xf32> to vector<4x1xf32>
    %cst_21 = arith.constant dense<0.000000e+00> : vector<1xf32>
    %52 = vector.multi_reduction <add>, %51, %cst_21 [0] : vector<4x1xf32> to vector<1xf32>
    %53 = vector.shape_cast %52 : vector<1xf32> to vector<1x1xf32>
    %cst_22 = arith.constant 2.560000e+02 : f32
    %54 = vector.broadcast %cst_22 : f32 to vector<1x1xf32>
    %55 = arith.divf %53, %54 : vector<1x1xf32>
    %cst_23 = arith.constant 9.99999974E-6 : f32
    %56 = vector.broadcast %cst_23 : f32 to vector<1x1xf32>
    %57 = arith.addf %55, %56 : vector<1x1xf32>
    %58 = math.rsqrt %57 : vector<1x1xf32>
    %59 = vector.shape_cast %58 : vector<1x1xf32> to vector<1x1xf32>
    %60 = vector.broadcast %59 : vector<1x1xf32> to vector<4x1xf32>
    %61 = tpu.concatenate %50, %60 in 0 : vector<4x1xf32>, vector<4x1xf32> -> vector<8x1xf32>
    %c0_24 = arith.constant 0 : index
    %c0_25 = arith.constant 0 : index
    %62 = vector.load %arg6[%c0_24, %c0_25] : memref<8x1xf32, #tpu.memory_space<vmem>>, vector<8x1xf32>
    %63 = arith.mulf %61, %62 : vector<8x1xf32>
    %64 = vector.broadcast %63 : vector<8x1xf32> to vector<8x64xf32>
    %65 = arith.mulf %37, %64 : vector<8x64xf32>
    %c0_26 = arith.constant 0 : index
    %c0_27 = arith.constant 0 : index
    %66 = vector.load %arg7[%c0_26, %c0_27] : memref<8x1xf32, #tpu.memory_space<vmem>>, vector<8x1xf32>
    %67 = vector.broadcast %66 : vector<8x1xf32> to vector<8x64xf32>
    %68 = arith.addf %65, %67 : vector<8x64xf32>
    %69 = arith.negf %68 : vector<8x64xf32>
    %70 = math.exp %69 : vector<8x64xf32>
    %cst_28 = arith.constant 1.000000e+00 : f32
    %71 = vector.broadcast %cst_28 : f32 to vector<8x64xf32>
    %72 = arith.addf %71, %70 : vector<8x64xf32>
    %73 = arith.divf %71, %72 : vector<8x64xf32>
    %74 = arith.mulf %68, %73 : vector<8x64xf32>
    %c0_29 = arith.constant 0 : index
    %c0_30 = arith.constant 0 : index
    %c0_31 = arith.constant 0 : index
    %75 = vector.load %arg8[%c0_29, %c0_30, %c0_31] : memref<1x8x64xf32, #tpu.memory_space<vmem>>, vector<1x8x64xf32>
    %76 = vector.shape_cast %75 : vector<1x8x64xf32> to vector<8x64xf32>
    %77 = vector.shape_cast %74 : vector<8x64xf32> to vector<1x8x64xf32>
    tpu.vector_store %arg8[%c0_29, %c0_30, %c0_31], %77 {strides = array<i32>} : memref<1x8x64xf32, #tpu.memory_space<vmem>>, vector<1x8x64xf32>,
    return
  }
  func.func @transform_0(%arg0: i32) -> (i32, i32, i32) {
    %c0_i32 = arith.constant 0 : i32
    %c0_i32_0 = arith.constant 0 : i32
    %c0_i32_1 = arith.constant 0 : i32
    return %arg0, %c0_i32, %c0_i32_0 : i32, i32, i32
  }
  func.func @transform_1(%arg0: i32) -> (i32, i32) {
    %c0_i32 = arith.constant 0 : i32
    %c0_i32_0 = arith.constant 0 : i32
    %c0_i32_1 = arith.constant 0 : i32
    return %c0_i32, %c0_i32_0 : i32, i32
  }
  func.func @transform_2(%arg0: i32) -> (i32, i32) {
    %c0_i32 = arith.constant 0 : i32
    %c0_i32_0 = arith.constant 0 : i32
    %c0_i32_1 = arith.constant 0 : i32
    return %c0_i32, %c0_i32_0 : i32, i32
  }
  func.func @transform_3(%arg0: i32) -> (i32, i32) {
    %c0_i32 = arith.constant 0 : i32
    %c0_i32_0 = arith.constant 0 : i32
    %c0_i32_1 = arith.constant 0 : i32
    return %c0_i32, %c0_i32_0 : i32, i32
  }
  func.func @transform_4(%arg0: i32) -> (i32, i32) {
    %c0_i32 = arith.constant 0 : i32
    %c0_i32_0 = arith.constant 0 : i32
    %c0_i32_1 = arith.constant 0 : i32
    return %c0_i32, %c0_i32_0 : i32, i32
  }
  func.func @transform_5(%arg0: i32) -> (i32, i32) {
    %c0_i32 = arith.constant 0 : i32
    %c0_i32_0 = arith.constant 0 : i32
    %c0_i32_1 = arith.constant 0 : i32
    return %c0_i32, %c0_i32_0 : i32, i32
  }
  func.func @transform_6(%arg0: i32) -> (i32, i32) {
    %c0_i32 = arith.constant 0 : i32
    %c0_i32_0 = arith.constant 0 : i32
    %c0_i32_1 = arith.constant 0 : i32
    return %c0_i32, %c0_i32_0 : i32, i32
  }
  func.func @transform_7(%arg0: i32) -> (i32, i32, i32) {
    %c0_i32 = arith.constant 0 : i32
    %c0_i32_0 = arith.constant 0 : i32
    %c0_i32_1 = arith.constant 0 : i32
    return %arg0, %c0_i32, %c0_i32_0 : i32, i32, i32
  }
}

</mosaic_0001>

<bundles_post_ra>
// kernel: tpu_custom_call.1
= control target key start
LH: loop header
LB: loop body
LE: loop exit
PB: predicated region body
PF: predicated region fallthrough
CT: control target
= control target key end

     0   :  { %12 = vsyncpa [#allocation3], 0  ;;  %s1054_s0 = inlined_call_operand.vmem [shape: f32[2,8,64], index: 0, kind: input, shape index: {}]   ;;  %s1055_s1 = inlined_call_operand.vmem [shape: f32[32,8], index: 1, kind: input, shape index: {}]   ;;  %s1056_s2 = inlined_call_operand.vmem [shape: f32[32,1], index: 2, kind: input, shape index: {}]   ;;  %s1057_s3 = inlined_call_operand.vmem [shape: f32[8,32], index: 3, kind: input, shape index: {}]   ;;  %s1058_s4 = inlined_call_operand.vmem [shape: f32[8,1], index: 4, kind: input, shape index: {}]   ;;  %s1059_s5 = inlined_call_operand.vmem [shape: f32[8,1], index: 5, kind: input, shape index: {}]   ;;  %s1060_s6 = inlined_call_operand.vmem [shape: f32[8,1], index: 6, kind: input, shape index: {}]   ;;  %s1061_s7 = inlined_call_operand.hbm [shape: f32[2,8,64], index: 7, kind: output, shape index: {}]  }
   0x1   :  { %14 = vsyncpa [#allocation3 + $0x1], 0  ;;  %s900_s24 = smov 0   ;;  %s902_s25 = smov 0  }
   0x2   :  { %s904_s26 = smov 0   ;;  %s906_s27 = smov 0  }
   0x3 LB: > { %s921_s28 = sadd.s32 4294967295, %s853_s27   ;;  %s667_s29 = sadd.s32 4294967294, %s853_s27   ;;  %s853_s27 = sphi %s906_s27, %s1067_s27   ;;  %s849_s26 = sphi %s904_s26, %s1066_s26   ;;  %s845_s25 = sphi %s902_s25, %s1065_s25   ;;  %s841_s24 = sphi %s900_s24, %s1064_s24  }
   0x4   : > { %s925_s30 = sadd.s32 1, %s853_s27   ;;  %s179_s8 = sadd.s32 1, %s849_s26 }
   0x5   : > { %s176_s9 = ssub.s32 %s853_s27, %s925_s30  ;;  %p189_p0 = scmp.ne.s32.totalorder %s849_s26, %s845_s25 }
   0x6   : > { %p177_p1 = scmp.eq.s32.totalorder %s176_s9, 0  ;;  %p190_p2 = scmp.eq.s32.totalorder %s921_s28, 1 }
   0x7   : > { %p195_p3 = scmp.ne.s32.totalorder %s845_s25, %s841_s24  ;;  %p196_p4 = scmp.eq.s32.totalorder %s667_s29, 1 }
   0x8   : > { %s936_s10 = scalar_select %p177_p1, %s849_s26, %s179_s8  }
   0x9   : > { %p938_p5 = por %p190_p2, %p189_p0  ;;  %p942_p6 = por %p196_p4, %p195_p3 }
   0xa   : > { %p670_p7 = scmp.ge.s32.totalorder %s853_s27, 1  ;;  %p239_p8 = scmp.lt.s32.totalorder %s853_s27, 3 }
   0xc   : > { %p240_p9 = pnand %p670_p7, %p239_p8 }
   0xd   : > { %p270_p10 = scmp.lt.s32.totalorder (!%p240_p9), %s921_s28, 1  ;;  %v275_v0 = vld [vmem:[%s1055_s1] sm:$0xff] (!%p240_p9)  ;;  %vm304_vm0 = vcmask (!%p240_p9), 64512   ;;  %v855_v1 = vmov (!%p240_p9), 0   ;;  %v282_v3 = vld [vmem:[%s1056_s2 + $0x10] sm:$0xff] (!%p240_p9)  ;;  %v281_v4 = vld [vmem:[%s1056_s2 + $0x8] sm:$0xff] (!%p240_p9) }
   0xe   : > { %243 = sbr.rel (%p240_p9) target bundleno = 1139 (0x473), region = 48  ;;  %699 = vmatprep.mubr.msk.f32.mxu0 (!%p240_p9), %vm304_vm0, %v275_v0  ;;  %765 = vset.pattern.permute.xlu0 (!%p240_p9), %v855_v1  ;;  %v280_v2 = vld [vmem:[%s1056_s2] sm:$0xff] (!%p240_p9)  ;;  %v283_v5 = vld [vmem:[%s1056_s2 + $0x18] sm:$0xff] (!%p240_p9)  ;;  %v276_v7 = vld [vmem:[%s1055_s1 + $0x8] sm:$0xff] (!%p240_p9)  ;;  %v856_v11 = vmov (!%p240_p9), 0.0|0.0   ;;  %vm857_vm1 = vmmov (!%p240_p9), 0  }
   0xf   : > { %286 = vperm.xlu0 (!%p240_p9), %765, %v280_v2   ;;  %766 = vset.pattern.permute.xlu1 (!%p240_p9), %v855_v1  ;;  %v277_v8 = vld [vmem:[%s1055_s1 + $0x10] sm:$0xff] (!%p240_p9)  ;;  %v430_v9 = vld [vmem:[%s1058_s4] sm:$0xff] (!%p240_p9)  ;;  %v278_v10 = vld [vmem:[%s1055_s1 + $0x18] sm:$0xff] (!%p240_p9)  ;;  %v858_v12 = vmov (!%p240_p9), 0.0   ;;  %vm436_vm2 = vcmask (!%p240_p9), 261120   ;;  %vm511_vm3 = vcmask (!%p240_p9), 523264  }
  0x10   : > { %296 = vperm.xlu1 (!%p240_p9), %766, %v282_v3   ;;  %716 = vmatprep.subr.bf16.mxu1 (!%p240_p9), %v856_v11  ;;  %v279_v47 = vld [vmem:[%s1057_s3] sm:$0xff] (!%p240_p9)  ;;  %vm515_vm4 = vcmask (!%p240_p9), 1043456   ;;  %s267_s14 = sand.u32 (!%p240_p9), 1, %s845_s25   ;;  %s684_s16 = sshll.u32 (!%p240_p9), %s921_s28, 7 }
  0x11   : > { %713 = vmatprep.mubr.msk.f32.mxu1 (!%p240_p9), %vm857_vm1, %v858_v12  ;;  %s671_s15 = sshll.u32 (!%p240_p9), %s267_s14, 3  ;;  %s1011_s21 = scalar_lea.hbm (!%p240_p9), %s1061_s7, %s684_s16 }
  0x12   : > { %s269_s18 = scalar_lea.vmem (!%p240_p9), [#allocation2], %s671_s15 }
  0x13   : > { %291 = vperm.xlu0 (!%p240_p9), %765, %v281_v4  }
  0x14   : > { %301 = vperm.xlu1 (!%p240_p9), %766, %v283_v5  }
  0x15   : > { %s271_s17 = scalar_select %p270_p10, %s921_s28, 1 }
  0x16   : > { %s859_s28 = smov [#allocation2]  }
  0x17   : > { %s672_s22 = sshll.u32 %s271_s17, 3  ;;  %433 = vperm.xlu0 %765, %v430_v9   ;;  %s608_s17 = sshll.u32 %s269_s18, 4  ;;  %s1013_s17 = int_to_ptr.vmem [resolvable:$true] %s608_s17 }
  0x18   : > { %s273_s13 = scalar_lea.vmem %s1054_s0, %s672_s22  ;;  %s595_s22 = scalar_lea.sflag [#allocation3], %s267_s14 }
  0x19   : > { %v969_v6 = vld [vmem:[%s273_s13] sm:$0xff]  ;;  %s791_s23 = scalar_lea.vmem %s1013_s17, 128  ;;  %s795_s29 = sshll.u32 %s859_s28, 4  ;;  %s796_s29 = int_to_ptr.vmem [resolvable:$false] %s795_s29 }
  0x1a   : > { %697 = vmatprep.subr.mxu0 %v969_v6  ;;  %p792_p11 = scmp.ne.s32.totalorder %s1013_s17, %s791_s23  ;;  %s797_s8 = scalar_lea.vmem %s796_s29, 256 }
  0x1b   : > { %698 = vmatpush3.msra.mxu0 %v969_v6  ;;  %p798_p0 = scmp.lt.s32.totalorder %s1013_s17, %s796_s29  ;;  %p799_p1 = scmp.lt.s32.totalorder %s797_s8, %s791_s23 }
  0x1c   : > { %700 = vmatmul.mubr.msk.f32.vlgmr.msra.gmra.mrb[0].mxu0 %vm304_vm0, %v276_v7  ;;  %p793_p12 = pnand %p792_p11, %p938_p5 }
  0x1d   : > { %702 = vmatprep.mubr.msk.f32.mxu0 %vm304_vm0, %v277_v8  ;;  %p800_p2 = por %p799_p1, %p798_p0 }
  0x1e   : > { %p794_p13 = pneg %p793_p12 }
  0x20   : > { %703 = vmatmul.mubr.msk.f32.gmra.mrb[2].mxu0 %vm304_vm0, %v278_v10  ;;  %p801_p3 = pnand %p800_p2, %p794_p13 }
  0x8e   : > { %v287_v13 = vpop.permute.xlu0 %286 }
  0x8f   : > { %v297_v14 = vpop.permute.xlu1 %296 }
  0x92   : > { %v292_v15 = vpop.permute.xlu0 %291 }
  0x93   : > { %v302_v21 = vpop.permute.xlu1 %301 }
  0x96   : > { %v434_v48 = vpop.permute.xlu0 %433 }
  0xef   : > { %v701_v16 = vpop.f32.mrb[0].mxu0 }
  0xf0   : > { %v389_v17 = vadd.f32 %v701_v16, %v292_v15  ;;  %v383_v18 = vpop.f32.mrb[1].mxu0 }
  0xf1   : > { %v384_v19 = vadd.f32 %v383_v18, %v287_v13  ;;  %v579_v13 = vld [vmem:[%s1060_s6] sm:$0xff] }
  0xf2   : > { %v678_v20 = vmul.f32 -1.442695, %v389_v17 }
  0xf3   : > { %v677_v22 = vmul.f32 -1.442695, %v384_v19  ;;  %v704_v23 = vpop.f32.mrb[2].mxu0 }
  0xf4   : > { %767 = vpow2.f32 %v678_v20  ;;  %v399_v24 = vadd.f32 %v704_v23, %v302_v21  ;;  %v393_v25 = vpop.f32.mrb[3].mxu0 }
  0xf5   : > { %769 = vpow2.f32 %v677_v22  ;;  %v394_v26 = vadd.f32 %v393_v25, %v297_v14 }
  0xf6   : > { %v680_v27 = vmul.f32 -1.442695, %v399_v24 }
  0xf7   : > { %v679_v28 = vmul.f32 -1.442695, %v394_v26 }
  0xf8   : > { %771 = vpow2.f32 %v680_v27 }
  0xf9   : > { %773 = vpow2.f32 %v679_v28 }
  0xfe   : > { %v768_v29 = vpop.eup %767 }
  0xff   : > { %v770_v30 = vpop.eup %769  ;;  %v415_v31 = vadd.f32 1.0, %v768_v29 }
 0x100   : > { %v414_v32 = vadd.f32 1.0, %v770_v30 }
 0x101   : > { %775 = vrcp.f32 %v415_v31 }
 0x102   : > { %v772_v33 = vpop.eup %771  ;;  %777 = vrcp.f32 %v414_v32 }
 0x103   : > { %v774_v34 = vpop.eup %773  ;;  %v417_v35 = vadd.f32 1.0, %v772_v33 }
 0x104   : > { %v416_v36 = vadd.f32 1.0, %v774_v34 }
 0x105   : > { %779 = vrcp.f32 %v417_v35  ;;  %v571_v35 = vld [vmem:[%s1059_s5] sm:$0xff] }
 0x106   : > { %781 = vrcp.f32 %v416_v36 }
 0x10b   : > { %v776_v37 = vpop.eup %775 }
 0x10c   : > { %v778_v38 = vpop.eup %777  ;;  %v427_v39 = vmul.f32 %v776_v37, %v389_v17 }
 0x10d   : > { %v426_v40 = vmul.f32 %v778_v38, %v384_v19 }
 0x10f   : > { %v780_v41 = vpop.eup %779  ;;  %v717_v42 = vpack.c.bf16 %v427_v39, %v426_v40 }
 0x110   : > { %v782_v43 = vpop.eup %781  ;;  %v429_v44 = vmul.f32 %v780_v41, %v399_v24 }
 0x111   : > { %v428_v45 = vmul.f32 %v782_v43, %v394_v26  ;;  %718 = vmatpush3.bf16.msra.mxu1 %v717_v42 }
 0x112   : > { %719 = vmatprep.subr.bf16.mxu1 %v856_v11 }
 0x113   : > { %v720_v46 = vpack.c.bf16 %v429_v44, %v428_v45 }
 0x115   : > { %721 = vmatpush3.bf16.msra.mxu1 %v720_v46 }
 0x118   : > { %714 = vmatmul.mubr.msk.f32.vlgmr.msra.gmra.mrb[0].mxu1 %vm436_vm2, %v279_v47 }
 0x1eb   : > { %v506_v49 = vpop.f32.mrb[0].mxu1 }
 0x1ec   : > { %v507_v50 = vadd.f32 %v506_v49, %v434_v48  ;;  %v715_v51 = vpop.f32.mrb[1].mxu1 }
 0x1ee   : > { %v510_v52 = vadd.f32 %v507_v50, %v969_v6 }
 0x1f0   : > { %v512_v53 = vsel %vm511_vm3, %v510_v52, 0.0 }
 0x1f1   : > { %513 = vadd.xlane.f32.xlu1 %v512_v53 }
 0x27e   : > { %v514_v54 = vpop.xlane.xlu1 %513 }
 0x27f   : > { %v516_v55 = vsel %vm515_vm4, %v514_v54, 0.0  ;;  %v526_v56 = vrot.slane %v514_v54, 4 }
 0x280   : > { %v517_v57 = vrot.slane %v516_v55, 4 }
 0x281   : > { %v528_v58 = vsel %vm515_vm4, %v526_v56, 0.0 }
 0x282   : > { %v518_v59 = vadd.f32 %v517_v57, %v516_v55  ;;  %v529_v60 = vrot.slane %v528_v58, 4 }
 0x284   : > { %v519_v61 = vrot.slane %v518_v59, 2  ;;  %v530_v62 = vadd.f32 %v529_v60, %v528_v58 }
 0x286   : > { %v520_v63 = vadd.f32 %v519_v61, %v518_v59  ;;  %v531_v0 = vrot.slane %v530_v62, 2 }
 0x288   : > { %v521_v1 = vrot.slane %v520_v63, 1  ;;  %v532_v2 = vadd.f32 %v531_v0, %v530_v62 }
 0x28a   : > { %v522_v3 = vadd.f32 %v521_v1, %v520_v63  ;;  %v533_v4 = vrot.slane %v532_v2, 1 }
 0x28c   : > { %v534_v5 = vadd.f32 %v533_v4, %v532_v2  ;;  %v524_v6 = vmul.f32 0.00390625, %v522_v3 }
 0x28e   : > { %v535_v7 = vmul.f32 0.00390625, %v534_v5 }
 0x290   : > { %v536_v8 = vsel %vm515_vm4, %v524_v6, %v535_v7 }
 0x291   : > { %539 = vperm.xlu0 %765, %v536_v8  }
 0x310   : > { %v540_v9 = vpop.permute.xlu0 %539 }
 0x311   : > { %v542_v10 = vsub.f32 %v510_v52, %v540_v9 }
 0x313   : > { %v543_v11 = vmul.f32 %v542_v10, %v542_v10 }
 0x315   : > { %v544_v12 = vsel %vm511_vm3, %v543_v11, 0.0 }
 0x316   : > { %545 = vadd.xlane.f32.xlu0 %v544_v12 }
 0x32c   : > { %582 = vperm.xlu0 %765, %v579_v13  }
 0x3a3   : > { %v546_v14 = vpop.xlane.xlu0 %545 }
 0x3a4   : > { %v547_v15 = vsel %vm515_vm4, %v546_v14, 0.0  ;;  %v558_v16 = vrot.slane %v546_v14, 4 }
 0x3a5   : > { %v548_v17 = vrot.slane %v547_v15, 4 }
 0x3a6   : > { %v560_v18 = vsel %vm515_vm4, %v558_v16, 0.0 }
 0x3a7   : > { %v549_v19 = vadd.f32 %v548_v17, %v547_v15  ;;  %v561_v20 = vrot.slane %v560_v18, 4 }
 0x3a9   : > { %v550_v21 = vrot.slane %v549_v19, 2  ;;  %v562_v22 = vadd.f32 %v561_v20, %v560_v18 }
 0x3ab   : > { %v551_v23 = vadd.f32 %v550_v21, %v549_v19  ;;  %v563_v24 = vrot.slane %v562_v22, 2  ;;  %v583_v41 = vpop.permute.xlu0 %582 }
 0x3ad   : > { %v552_v25 = vrot.slane %v551_v23, 1  ;;  %v564_v26 = vadd.f32 %v563_v24, %v562_v22 }
 0x3af   : > { %v553_v27 = vadd.f32 %v552_v25, %v551_v23  ;;  %v565_v28 = vrot.slane %v564_v26, 1 }
 0x3b1   : > { %v554_v29 = vmul.f32 0.00390625, %v553_v27  ;;  %v566_v30 = vadd.f32 %v565_v28, %v564_v26 }
 0x3b3   : > { %v555_v31 = vadd.f32 1e-05, %v554_v29  ;;  %v567_v32 = vmul.f32 0.00390625, %v566_v30 }
 0x3b5   : > { %v568_v33 = vadd.f32 1e-05, %v567_v32  ;;  %783 = vrsqrt.f32 %v555_v31 }
 0x3b7   : > { %785 = vrsqrt.f32 %v568_v33 }
 0x3bf   : > { %v784_v34 = vpop.eup %783 }
 0x3c1   : > { %v786_v36 = vpop.eup %785 }
 0x3c2   : > { %v570_v37 = vsel %vm515_vm4, %v784_v34, %v786_v36 }
 0x3c3   : > { %v572_v38 = vmul.f32 %v571_v35, %v570_v37 }
 0x3c5   : > { %575 = vperm.xlu1 %766, %v572_v38  }
 0x444   : > { %v576_v39 = vpop.permute.xlu1 %575 }
 0x445   : > { %v578_v40 = vmul.f32 %v576_v39, %v542_v10 }
 0x447   : > { %v585_v42 = vadd.f32 %v583_v41, %v578_v40 }
 0x449   : > { %v682_v43 = vmul.f32 -1.442695, %v585_v42 }
 0x44b   : > { %787 = vpow2.f32 %v682_v43 }
 0x455   : > { %v788_v44 = vpop.eup %787 }
 0x456   : > { %v589_v45 = vadd.f32 1.0, %v788_v44 }
 0x458   : > { %789 = vrcp.f32 %v589_v45 }
 0x462   : > { %v790_v46 = vpop.eup %789 }
 0x463   : > { %v592_v47 = vmul.f32 %v790_v46, %v585_v42 }
 0x465   : > { %593 = vst.msk [vmem:[%s269_s18] sm:$0xff] %vm511_vm3, %v592_v47 }
 0x466   : > { %804 = shalt.err (!%p801_p3)
}
 0x467   : > { %s805_s9 = scalar_lea.hbm %s1011_s21, 128  ;;  %s809_s15 = scalar_lea.hbm %s1061_s7, 256 }
 0x468   : > { %p806_p4 = scmp.ne.s32.totalorder %s1011_s21, %s805_s9  ;;  %p810_p9 = scmp.lt.u32.totalorder %s1011_s21, %s1061_s7 }
 0x469   : > { %p811_p10 = scmp.lt.u32.totalorder %s809_s15, %s805_s9  ;;  %p813_p12 = scmp.lt.u32.totalorder %s805_s9, %s1011_s21 }
 0x46a   : > { %p807_p7 = pnand %p806_p4, %p938_p5 }
 0x46b   : > { %p812_p11 = por %p811_p10, %p810_p9 }
 0x46c   : > { %p808_p8 = pneg %p807_p7 }
 0x46d   : > { %p814_p13 = por %p813_p12, %p812_p11 }
 0x46f   : > { %p815_p0 = pnand %p814_p13, %p808_p8 }
 0x471   : > { %818 = shalt.err (!%p815_p0)
}
 0x472   : > { %722 = dma.vmem_to_hbm [thread:$0]  (%p938_p5), %s1013_s17, 128, %s1011_s21, %s595_s22  }
 0x473 PF: > { %p728_p1 = scmp.ge.s32.totalorder %s853_s27, 2  ;;  %s620_s19 = sand.u32 1, %s841_s24  }
 0x474   : > { %s621_s20 = scalar_lea.sflag [#allocation3], %s620_s19 }
 0x475   : > { %p725_p2 = pnand %p728_p1, %p942_p6 }
 0x477   : > { %836 = dma.done.wait (!%p725_p2), %s621_s20, 128  }
 0x478   : > { %838 = vsyncadd (!%p725_p2), %s621_s20, 4294967168  ;;  %p17_p3 = scmp.ge.s32.totalorder %s925_s30, 4   ;;  %s1064_s24 = smov %s845_s25 }
 0x479   : > { %s1065_s25 = smov %s849_s26  ;;  %s1066_s26 = smov %s936_s10 }
 0x47a   : > { %s1067_s27 = smov %s925_s30  ;;  %19 = sbr.rel (!%p17_p3) target bundleno = 3 (0x3), region = 83 }
 0x481   :  { %626 = vsyncpa [#allocation3], 1 }
 0x482   :  { %628 = vsyncpa [#allocation3 + $0x1], 1 }

</bundles_post_ra>
